<compile_context>
chip_gen: v6e
topology: v6e:2x2x1
jax: 0.10.0
libtpu: 0.0.40
codegen_flags: <defaults>
</compile_context>

<pallas_src>
import functools
import math

import jax
import jax.numpy as jnp
from jax import lax
from jax.experimental import pallas as pl
from jax.experimental.pallas import tpu as pltpu


def _gem_kernel(p_ref, x_ref, o_ref, acc_ref, *,
                eps, log_hw, hw, tile_hw, mask_tail, static_p):
    """One grid step (i, j): accumulate sum_k clamp(x)^p over one HW chunk.

    p_ref   : SMEM (1,) f32            -- learnable exponent p (staged once)
    x_ref   : VMEM (tile_nc, tile_hw)  -- input chunk (f32 or bf16)
    o_ref   : VMEM (tile_nc, 1) f32    -- pooled output (written at last j)
    acc_ref : VMEM (tile_nc, 1) f32    -- running sum of x^p over the HW axis
    """
    j = pl.program_id(1)

    @pl.when(j == 0)
    def _():
        acc_ref[...] = jnp.zeros_like(acc_ref)

    x = x_ref[...].astype(jnp.float32)
    xc = jnp.maximum(x, eps)                        # clamp(min=eps)

    if static_p is not None:
        # p statically known to be a (half-)integer (default p=3): x^p via VPU
        # multiplies (+ one EUP sqrt for the .5) -- no per-element exp/log.
        int_part, has_half = static_p
        if has_half:
            xp = jnp.sqrt(xc)
            n_mul = int_part
        else:
            xp = xc
            n_mul = int_part - 1
        for _ in range(n_mul):
            xp = xp * xc
    else:
        # Generic runtime-p path: x^p = exp(p*log(x)), valid since xc >= eps > 0.
        p = p_ref[0]
        xp = jnp.exp(p * jnp.log(xc))

    if mask_tail:
        # Ragged last HW block: zero out-of-range columns so garbage lanes do
        # not contaminate the sum (global column index vs the true HW extent).
        col = j * tile_hw + lax.broadcasted_iota(jnp.int32, xp.shape, 1)
        xp = jnp.where(col < hw, xp, 0.0)

    acc_ref[...] += jnp.sum(xp, axis=-1, keepdims=True)   # f32 accumulate

    @pl.when(j == pl.num_programs(1) - 1)
    def _():
        # mean^(1/p) == exp((log(sum) - log(HW)) / p): O(NC) transcendentals.
        if static_p is not None:
            int_part, has_half = static_p
            inv_p = 1.0 / (float(int_part) + (0.5 if has_half else 0.0))
        else:
            inv_p = 1.0 / p_ref[0]
        o_ref[...] = jnp.exp((jnp.log(acc_ref[...]) - log_hw) * inv_p)


def gem_pool(x, p, eps=1e-6, *, _tile_nc=None, _tile_hw=None):
    """GeM pooling. x: (N, C, H, W), p: (1,) float -> (N, C, 1, 1)."""
    N, C, H, W = x.shape
    NC, HW = N * C, H * W

    # Keep bf16 inputs in bf16 (halves HBM traffic); everything else -> f32.
    in_dtype = x.dtype if x.dtype in (jnp.float32, jnp.bfloat16) else jnp.float32
    x_flat = x.reshape(NC, HW).astype(in_dtype)
    p_arr = jnp.asarray(p, dtype=jnp.float32).reshape((1,))

    # Trace-time specialization: concrete integer or half-integer p drops the
    # per-element exp/log.  Traced / generic p falls back to the runtime path.
    static_p = None
    try:
        pv = float(jax.device_get(p_arr)[0])
        two_p = 2.0 * pv
        if two_p == round(two_p) and 1.0 <= pv <= 8.0:
            tp = int(round(two_p))
            static_p = (tp // 2, bool(tp % 2))
    except Exception:
        static_p = None

    itemsize = jnp.dtype(in_dtype).itemsize
    sublane = 8 * (4 // itemsize)               # 8 rows for f32, 16 for bf16
    hw_padded = pl.cdiv(HW, 128) * 128          # lane-padded row length in VMEM

    # ---- Per-generation VMEM budget --------------------------------------
    try:
        info = pltpu.get_tpu_info()
        vmem_cap = int(getattr(info, "vmem_capacity_bytes", 64 * 1024 * 1024))
    except Exception:
        vmem_cap = 64 * 1024 * 1024             # conservative (v7x physical)

    if vmem_cap >= 100 * 1024 * 1024:           # v5e / v6e: 128 MiB VMEM
        live_budget = 40 * 1024 * 1024
        vmem_limit = 80 * 1024 * 1024
    else:                                       # v7x: 64 MiB physical
        live_budget = 16 * 1024 * 1024
        vmem_limit = 40 * 1024 * 1024

    # Budget counts the double-buffered input tile AND the ~3 full-tile f32
    # temporaries (upcast, clamp, pow) the kernel body materializes.
    per_elem_live = 2 * itemsize + 3 * 4
    max_tile_elems = max(live_budget // per_elem_live, sublane * 128)

    nc_rounded = pl.cdiv(NC, sublane) * sublane

    if sublane * hw_padded <= max_tile_elems:
        # Full spatial rows fit comfortably: block only over NC.
        tile_hw = HW
        tile_nc = (max_tile_elems // hw_padded) // sublane * sublane
        tile_nc = max(sublane, min(tile_nc, nc_rounded))
    else:
        # Huge feature maps: block the HW reduction too (128-lane multiples)
        # and accumulate per-row partial sums in scratch.
        tile_nc = sublane
        tile_hw = max(128, ((max_tile_elems // sublane) // 128) * 128)

    if _tile_nc is not None:                    # test hooks
        tile_nc = _tile_nc
    if _tile_hw is not None:
        tile_hw = _tile_hw

    mask_tail = (tile_hw != HW) and (HW % tile_hw != 0)
    grid = (pl.cdiv(NC, tile_nc), pl.cdiv(HW, tile_hw))

    if static_p is not None:
        int_part, has_half = static_p
        flops = int((int_part + 2) * NC * HW)
        transcendentals = int((NC * HW if has_half else 0) + 2 * NC)
    else:
        flops = int(3 * NC * HW)
        transcendentals = int(2 * NC * HW + 2 * NC)
    cost = pl.CostEstimate(
        flops=flops,
        transcendentals=transcendentals,
        bytes_accessed=int(NC * HW * itemsize + NC * 4 + 4),
    )

    kernel = functools.partial(
        _gem_kernel,
        eps=float(eps), log_hw=float(math.log(HW)),
        hw=HW, tile_hw=tile_hw, mask_tail=mask_tail, static_p=static_p,
    )

    out_flat = pl.pallas_call(
        kernel,
        out_shape=jax.ShapeDtypeStruct((NC, 1), jnp.float32),
        grid=grid,
        in_specs=[
            pl.BlockSpec(memory_space=pltpu.SMEM),                 # p (staged once)
            pl.BlockSpec((tile_nc, tile_hw), lambda i, j: (i, j)),  # x chunks
        ],
        out_specs=pl.BlockSpec((tile_nc, 1), lambda i, j: (i, 0)),
        scratch_shapes=[pltpu.VMEM((tile_nc, 1), jnp.float32)],
        compiler_params=pltpu.CompilerParams(
            dimension_semantics=("parallel", "arbitrary"),
            vmem_limit_bytes=vmem_limit,
        ),
        cost_estimate=cost,
    )(p_arr, x_flat)

    return out_flat.reshape(N, C, 1, 1).astype(x.dtype)


class GeM:
    """JAX mirror of the PyTorch GeM module (learnable scalar p, default 3)."""

    def __init__(self, p=3, eps=1e-6):
        self.p = jnp.ones((1,), dtype=jnp.float32) * p   # deterministic init
        self.eps = eps

    def __call__(self, x):
        return gem_pool(x, self.p, self.eps)


if __name__ == "__main__":
    key = jax.random.PRNGKey(0)
    x = jax.random.normal(key, (2, 4, 16, 16), dtype=jnp.float32)
    eps = 1e-6

    def ref_gem(xx, pv, eps=1e-6):
        return jnp.mean(jnp.maximum(xx, eps) ** pv,
                        axis=(-2, -1), keepdims=True) ** (1.0 / pv)

    # 1) Default module (p=3): integer-p VPU fast path, single HW block.
    mod = GeM(p=3, eps=eps)
    out = jax.block_until_ready(mod(x))
    assert out.shape == (2, 4, 1, 1), out.shape
    assert jnp.allclose(out, ref_gem(x, 3.0, eps), rtol=1e-4, atol=1e-5), \
        float(jnp.max(jnp.abs(out - ref_gem(x, 3.0, eps))))

    # 2) Half-integer p (2.5): x^2 * sqrt(x) fast path (no per-element exp/log).
    out2 = jax.block_until_ready(gem_pool(x, jnp.asarray([2.5], jnp.float32), eps))
    assert jnp.allclose(out2, ref_gem(x, 2.5, eps), rtol=1e-4, atol=1e-5), \
        float(jnp.max(jnp.abs(out2 - ref_gem(x, 2.5, eps))))

    # 3) Generic runtime-p path (p=2.2): exp/log fallback.
    out3 = jax.block_until_ready(gem_pool(x, jnp.asarray([2.2], jnp.float32), eps))
    assert jnp.allclose(out3, ref_gem(x, 2.2, eps), rtol=1e-4, atol=1e-5), \
        float(jnp.max(jnp.abs(out3 - ref_gem(x, 2.2, eps))))

    # 4) Blocked HW reduction + ragged tail mask (HW=300, forced tile_hw=128).
    x2 = jax.random.normal(jax.random.PRNGKey(1), (2, 4, 15, 20), dtype=jnp.float32)
    out4 = jax.block_until_ready(
        gem_pool(x2, jnp.asarray([3.0], jnp.float32), eps, _tile_hw=128))
    assert jnp.allclose(out4, ref_gem(x2, 3.0, eps), rtol=1e-4, atol=1e-5), \
        float(jnp.max(jnp.abs(out4 - ref_gem(x2, 3.0, eps))))

    print("KERNEL_OK")
</pallas_src>

<mosaic_0001>
module attributes {stable_mosaic.version = 11 : i64} {
  func.func @_gem_kernel(%arg0: i32, %arg1: i32, %arg2: memref<1xf32, #tpu.memory_space<smem>>, %arg3: memref<8x256xf32, #tpu.memory_space<vmem>>, %arg4: memref<8x1xf32, #tpu.memory_space<vmem>>, %arg5: memref<8x1xf32, #tpu.memory_space<vmem>>) attributes {dimension_semantics = [#tpu.dimension_semantics<parallel>, #tpu.dimension_semantics<arbitrary>], iteration_bounds = array<i64: 1, 1>, scalar_prefetch = 0 : i64, scratch_operands = 1 : i64, tpu.core_type = #tpu.core_type<tc>, window_params = [{transform_indices = @transform_0, window_bounds = array<i64: 1>}, {transform_indices = @transform_1, window_bounds = array<i64: 8, 256>}, {transform_indices = @transform_2, window_bounds = array<i64: 8, 1>}]} {
    %c0_i32 = arith.constant 0 : i32
    %0 = arith.cmpi eq, %arg1, %c0_i32 : i32
    %1 = arith.extui %0 : i1 to i32
    %c0_i32_0 = arith.constant 0 : i32
    %2 = arith.cmpi ne, %1, %c0_i32_0 : i32
    scf.if %2 {
      %cst_9 = arith.constant 0.000000e+00 : f32
      %16 = vector.broadcast %cst_9 : f32 to vector<8x1xf32>
      %c0_10 = arith.constant 0 : index
      %c0_11 = arith.constant 0 : index
      %17 = vector.load %arg5[%c0_10, %c0_11] : memref<8x1xf32, #tpu.memory_space<vmem>>, vector<8x1xf32>
      tpu.vector_store %arg5[%c0_10, %c0_11], %16 {strides = array<i32>} : memref<8x1xf32, #tpu.memory_space<vmem>>, vector<8x1xf32>,
    } else {
    }
    %c0 = arith.constant 0 : index
    %c0_1 = arith.constant 0 : index
    %3 = vector.load %arg3[%c0, %c0_1] : memref<8x256xf32, #tpu.memory_space<vmem>>, vector<8x256xf32>
    %cst = arith.constant 9.99999997E-7 : f32
    %4 = vector.broadcast %cst : f32 to vector<8x256xf32>
    %5 = arith.maximumf %3, %4 : vector<8x256xf32>
    %6 = arith.mulf %5, %5 : vector<8x256xf32>
    %7 = arith.mulf %6, %5 : vector<8x256xf32>
    %c0_2 = arith.constant 0 : index
    %c0_3 = arith.constant 0 : index
    %8 = vector.load %arg5[%c0_2, %c0_3] : memref<8x1xf32, #tpu.memory_space<vmem>>, vector<8x1xf32>
    %cst_4 = arith.constant dense<0.000000e+00> : vector<8xf32>
    %9 = vector.multi_reduction <add>, %7, %cst_4 [1] : vector<8x256xf32> to vector<8xf32>
    %10 = vector.shape_cast %9 : vector<8xf32> to vector<8x1xf32>
    %11 = arith.addf %8, %10 : vector<8x1xf32>
    %c0_5 = arith.constant 0 : index
    %c0_6 = arith.constant 0 : index
    %12 = vector.load %arg5[%c0_5, %c0_6] : memref<8x1xf32, #tpu.memory_space<vmem>>, vector<8x1xf32>
    tpu.vector_store %arg5[%c0_5, %c0_6], %11 {strides = array<i32>} : memref<8x1xf32, #tpu.memory_space<vmem>>, vector<8x1xf32>,
    %c0_i32_7 = arith.constant 0 : i32
    %13 = arith.cmpi eq, %arg1, %c0_i32_7 : i32
    %14 = arith.extui %13 : i1 to i32
    %c0_i32_8 = arith.constant 0 : i32
    %15 = arith.cmpi ne, %14, %c0_i32_8 : i32
    scf.if %15 {
      %c0_9 = arith.constant 0 : index
      %c0_10 = arith.constant 0 : index
      %16 = vector.load %arg5[%c0_9, %c0_10] : memref<8x1xf32, #tpu.memory_space<vmem>>, vector<8x1xf32>
      %17 = math.log %16 : vector<8x1xf32>
      %cst_11 = arith.constant 5.54517746 : f32
      %18 = vector.broadcast %cst_11 : f32 to vector<8x1xf32>
      %19 = arith.subf %17, %18 : vector<8x1xf32>
      %cst_12 = arith.constant 0.333333343 : f32
      %20 = vector.broadcast %cst_12 : f32 to vector<8x1xf32>
      %21 = arith.mulf %19, %20 : vector<8x1xf32>
      %22 = math.exp %21 : vector<8x1xf32>
      %c0_13 = arith.constant 0 : index
      %c0_14 = arith.constant 0 : index
      %23 = vector.load %arg4[%c0_13, %c0_14] : memref<8x1xf32, #tpu.memory_space<vmem>>, vector<8x1xf32>
      tpu.vector_store %arg4[%c0_13, %c0_14], %22 {strides = array<i32>} : memref<8x1xf32, #tpu.memory_space<vmem>>, vector<8x1xf32>,
    } else {
    }
    return
  }
  func.func @transform_0(%arg0: i32, %arg1: i32) -> i32 {
    %c0_i32 = arith.constant 0 : i32
    %c0_i32_0 = arith.constant 0 : i32
    return %c0_i32 : i32
  }
  func.func @transform_1(%arg0: i32, %arg1: i32) -> (i32, i32) {
    %c0_i32 = arith.constant 0 : i32
    return %arg0, %arg1 : i32, i32
  }
  func.func @transform_2(%arg0: i32, %arg1: i32) -> (i32, i32) {
    %c0_i32 = arith.constant 0 : i32
    %c0_i32_0 = arith.constant 0 : i32
    return %arg0, %c0_i32 : i32, i32
  }
}

</mosaic_0001>

<bundles_post_ra>
// kernel: tpu_custom_call.1
= control target key start
LH: loop header
LB: loop body
LE: loop exit
PB: predicated region body
PF: predicated region fallthrough
CT: control target
= control target key end

     0   :  { %8 = vsyncpa [#allocation5], 0  ;;  %s90_s9 = smov [#allocation4]   ;;  %s116_s0 = inlined_call_operand.<no memory space> [shape: f32[1], index: 0, kind: input, shape index: {}]   ;;  %s117_s1 = inlined_call_operand.hbm [shape: f32[8,256], index: 1, kind: input, shape index: {}]   ;;  %s118_s2 = inlined_call_operand.vmem [shape: f32[8,1], index: 2, kind: output, shape index: {}]  }
   0x1   :  { %s17_s10 = sshll.u32 %s90_s9, 4  ;;  %s18_s10 = int_to_ptr.vmem [resolvable:$true] %s17_s10 }
   0x2   :  { %s76_s11 = scalar_lea.vmem %s18_s10, 256  ;;  %p81_p1 = scmp.lt.s32.totalorder %s18_s10, %s18_s10 }
   0x3   :  { %p77_p0 = scmp.ne.s32.totalorder %s18_s10, %s76_s11  ;;  %p82_p2 = scmp.lt.s32.totalorder %s76_s11, %s76_s11 }
   0x5   :  { %p83_p3 = por %p82_p2, %p81_p1 }
   0x7   :  { %p84_p4 = pnand %p83_p3, %p77_p0 }
   0x9   :  { %87 = shalt.err (!%p84_p4)
}
   0xa   :  { %20 = dma.hbm_to_vmem [thread:$0]  %s117_s1, 256, %s18_s10, [#allocation5]  }
   0xb   :  { %88 = dma.done.wait [#allocation5], 256  }
   0xc   :  { %89 = vsyncadd [#allocation5], 4294967040  ;;  %vm28_vm0 = vcmask 7168   ;;  %v91_v0 = vmov 0.0   ;;  %v30_v1 = vld [vmem:[#allocation4] sm:$0xff]  ;;  %v31_v2 = vld [vmem:[#allocation4 + $0x8] sm:$0xff] }
   0xd   :  { %29 = vst.msk [vmem:[#allocation2] sm:$0xff] %vm28_vm0, %v91_v0  ;;  %v32_v3 = vmax.f32 %v30_v1, 1e-06  ;;  %v33_v4 = vmax.f32 %v31_v2, 1e-06 }
   0xf   :  { %v34_v5 = vmul.f32 %v32_v3, %v32_v3  ;;  %v35_v6 = vmul.f32 %v33_v4, %v33_v4 }
  0x11   :  { %v36_v7 = vmul.f32 %v34_v5, %v32_v3  ;;  %v37_v8 = vmul.f32 %v35_v6, %v33_v4 }
  0x13   :  { %v39_v9 = vadd.f32 %v37_v8, %v36_v7 }
  0x14   :  { %v38_v10 = vld [vmem:[#allocation2] sm:$0xff] }
  0x15   :  { %40 = vadd.xlane.f32.xlu0 %v39_v9 }
  0x9e   :  { %v41_v11 = vpop.xlane.xlu0 %40 }
  0x9f   :  { %v42_v12 = vadd.f32 %v41_v11, %v38_v10 }
  0xa1   :  { %44 = vst.msk [vmem:[#allocation2] sm:$0xff] %vm28_vm0, %v42_v12 }
  0xa8   :  { %v48_v13 = vld [vmem:[#allocation2] sm:$0xff] }
  0xa9   :  { %64 = vlog2.f32 %v48_v13 }
  0xb6   :  { %v65_v14 = vpop.eup %64 }
  0xb7   :  { %v50_v15 = vmul.f32 0.6931472, %v65_v14 }
  0xb9   :  { %v61_v16 = vadd.f32 -5.5451775, %v50_v15 }
  0xbb   :  { %v52_v17 = vmul.f32 0.33333334, %v61_v16 }
  0xbd   :  { %v53_v18 = vmul.f32 1.442695, %v52_v17 }
  0xbf   :  { %66 = vpow2.f32 %v53_v18 }
  0xcc   :  { %v67_v19 = vpop.eup %66 }
  0xcd   :  { %55 = vst.msk [vmem:[%s118_s2] sm:$0xff] %vm28_vm0, %v67_v19 }
  0xce   :  { %60 = vsyncpa [#allocation5], 1 }

</bundles_post_ra>
